<compile_context>
chip_gen: v5e
topology: v5e:2x2
jax: 0.10.0
libtpu: 0.0.40
codegen_flags: <defaults>
</compile_context>

<pallas_src>
import functools

import jax
import jax.numpy as jnp
from jax.experimental import pallas as pl
from jax.experimental.pallas import tpu as pltpu


def _round_up(x, m):
    return ((x + m - 1) // m) * m


def _actor_kernel_ctx(max_action,
                      s_ref, c_ref,
                      w1s_ref, w1c_ref, b1_ref,
                      w2_ref, b2_ref,
                      w3_ref, b3_ref,
                      out_ref):
    """Fused-concat Actor forward for one (TB, ...) batch tile."""
    # Layer 1: cat([s, c]) @ W1 == s @ W1s + c @ W1c   (concat folded away).
    h = jnp.dot(s_ref[...], w1s_ref[...], preferred_element_type=jnp.float32)
    h = h + jnp.dot(c_ref[...], w1c_ref[...], preferred_element_type=jnp.float32)
    h = jnp.maximum(h + b1_ref[...], 0.0)
    # Layer 2: Linear + ReLU.
    h = jnp.dot(h, w2_ref[...], preferred_element_type=jnp.float32) + b2_ref[...]
    h = jnp.maximum(h, 0.0)
    # Output layer (padded to lane-dense width) + tanh squash (EUP).
    o = jnp.dot(h, w3_ref[...], preferred_element_type=jnp.float32) + b3_ref[...]
    out_ref[...] = (max_action * jnp.tanh(o)).astype(out_ref.dtype)


def _actor_kernel_noctx(max_action,
                        s_ref,
                        w1_ref, b1_ref,
                        w2_ref, b2_ref,
                        w3_ref, b3_ref,
                        out_ref):
    """Actor forward without a context input."""
    h = jnp.dot(s_ref[...], w1_ref[...], preferred_element_type=jnp.float32) + b1_ref[...]
    h = jnp.maximum(h, 0.0)
    h = jnp.dot(h, w2_ref[...], preferred_element_type=jnp.float32) + b2_ref[...]
    h = jnp.maximum(h, 0.0)
    o = jnp.dot(h, w3_ref[...], preferred_element_type=jnp.float32) + b3_ref[...]
    out_ref[...] = (max_action * jnp.tanh(o)).astype(out_ref.dtype)


def actor_forward(state, params, max_action, context=None, block_batch=128):
    """Pallas Actor forward.

    params = [(W1, b1), (W2, b2), (W3, b3)] with W stored as
    (in_features, out_features) (transpose of PyTorch nn.Linear storage)
    and b as (1, out_features).
    """
    (w1, b1), (w2, b2), (w3, b3) = params
    B, state_dim = state.shape
    h1 = w1.shape[1]
    h2 = w2.shape[1]
    action_dim = w3.shape[1]
    ctx_dim = 0 if context is None else context.shape[1]

    # ---- lane-dense output: pad last-layer out features to a 128 multiple ----
    out_pad = _round_up(action_dim, 128)
    if out_pad != action_dim:
        w3 = jnp.pad(w3, ((0, 0), (0, out_pad - action_dim)))
        b3 = jnp.pad(b3, ((0, 0), (0, out_pad - action_dim)))

    # ---- batch tiling: TB rows per grid step (sublane-aligned) ----
    TB = min(block_batch, _round_up(B, 8))
    B_pad = _round_up(B, TB)
    if B_pad != B:
        state = jnp.pad(state, ((0, B_pad - B), (0, 0)))
        if context is not None:
            context = jnp.pad(context, ((0, B_pad - B), (0, 0)))
    grid = (B_pad // TB,)

    def tile_spec(d):       # per-grid-step activation tile
        return pl.BlockSpec((TB, d), lambda i: (i, 0))

    def resident(arr):      # weights / biases stay VMEM-resident across steps
        return pl.BlockSpec(arr.shape, lambda i: (0, 0))

    if context is not None:
        w1s = w1[:state_dim]     # split W1 once on the host -> fused concat
        w1c = w1[state_dim:]
        kernel = functools.partial(_actor_kernel_ctx, float(max_action))
        args = (state, context, w1s, w1c, b1, w2, b2, w3, b3)
        in_specs = [tile_spec(state_dim), tile_spec(ctx_dim),
                    resident(w1s), resident(w1c), resident(b1),
                    resident(w2), resident(b2),
                    resident(w3), resident(b3)]
    else:
        kernel = functools.partial(_actor_kernel_noctx, float(max_action))
        args = (state, w1, b1, w2, b2, w3, b3)
        in_specs = [tile_spec(state_dim),
                    resident(w1), resident(b1),
                    resident(w2), resident(b2),
                    resident(w3), resident(b3)]

    flops = 2 * B_pad * ((state_dim + ctx_dim) * h1 + h1 * h2 + h2 * out_pad)
    bytes_accessed = 4 * (sum(int(a.size) for a in args) + B_pad * out_pad)
    cost = pl.CostEstimate(flops=int(flops),
                           transcendentals=int(B_pad * out_pad),
                           bytes_accessed=int(bytes_accessed))

    out = pl.pallas_call(
        kernel,
        out_shape=jax.ShapeDtypeStruct((B_pad, out_pad), jnp.float32),
        grid=grid,
        in_specs=in_specs,
        out_specs=pl.BlockSpec((TB, out_pad), lambda i: (i, 0)),
        compiler_params=pltpu.CompilerParams(
            dimension_semantics=("parallel",)),
        cost_estimate=cost,
    )(*args)

    # Slice padded batch rows and padded action lanes back off.
    return out[:B, :action_dim]


def init_linear(key, in_dim, out_dim):
    """Deterministic init matching nn.Linear's default U(-1/sqrt(in), 1/sqrt(in)).
    Weight returned as (in_dim, out_dim) (transposed vs. PyTorch storage)."""
    kw, kb = jax.random.split(key)
    bound = 1.0 / jnp.sqrt(jnp.float32(in_dim))
    w = jax.random.uniform(kw, (in_dim, out_dim), jnp.float32, -bound, bound)
    b = jax.random.uniform(kb, (1, out_dim), jnp.float32, -bound, bound)
    return w, b


def _reference(state, params, max_action, context=None):
    x = jnp.concatenate([state, context], axis=1) if context is not None else state
    (w1, b1), (w2, b2), (w3, b3) = params
    h = jnp.maximum(x @ w1 + b1, 0.0)
    h = jnp.maximum(h @ w2 + b2, 0.0)
    return max_action * jnp.tanh(h @ w3 + b3)


if __name__ == "__main__":
    # Shapes consistent with Actor(hidden_layers=[32, 32], state_dim=16,
    # action_dim=4, max_action=2.0, context_size=8).  batch=20 with an 8-row
    # batch tile exercises the grid (3 steps) and the batch-padding path.
    batch = 20
    state_dim = 16
    context_size = 8
    hidden_layers = [32, 32]
    action_dim = 4
    max_action = 2.0

    key = jax.random.PRNGKey(0)
    k_state, k_ctx, k1, k2, k3 = jax.random.split(key, 5)

    state = jax.random.normal(k_state, (batch, state_dim), jnp.float32)
    context = jax.random.normal(k_ctx, (batch, context_size), jnp.float32)

    in_dim = state_dim + context_size
    params = [
        init_linear(k1, in_dim, hidden_layers[0]),
        init_linear(k2, hidden_layers[0], hidden_layers[1]),
        init_linear(k3, hidden_layers[1], action_dim),
    ]

    # Main run: fused-concat kernel with batch grid.
    out = actor_forward(state, params, max_action, context=context, block_batch=8)
    out = jax.block_until_ready(out)
    ref = _reference(state, params, max_action, context=context)
    assert out.shape == (batch, action_dim)
    assert jnp.allclose(out, ref, atol=1e-5, rtol=1e-5)

    # Also check the context=None path of the module (first layer must accept
    # state_dim inputs in that configuration).
    params_noctx = [
        init_linear(k1, state_dim, hidden_layers[0]),
        init_linear(k2, hidden_layers[0], hidden_layers[1]),
        init_linear(k3, hidden_layers[1], action_dim),
    ]
    out2 = actor_forward(state, params_noctx, max_action, context=None, block_batch=8)
    out2 = jax.block_until_ready(out2)
    ref2 = _reference(state, params_noctx, max_action, context=None)
    assert jnp.allclose(out2, ref2, atol=1e-5, rtol=1e-5)

    print("KERNEL_OK")
</pallas_src>

<mosaic_0001>
module attributes {stable_mosaic.version = 11 : i64} {
  func.func @_actor_kernel_ctx(%arg0: i32, %arg1: memref<8x16xf32, #tpu.memory_space<vmem>>, %arg2: memref<8x8xf32, #tpu.memory_space<vmem>>, %arg3: memref<16x32xf32, #tpu.memory_space<vmem>>, %arg4: memref<8x32xf32, #tpu.memory_space<vmem>>, %arg5: memref<1x32xf32, #tpu.memory_space<vmem>>, %arg6: memref<32x32xf32, #tpu.memory_space<vmem>>, %arg7: memref<1x32xf32, #tpu.memory_space<vmem>>, %arg8: memref<32x128xf32, #tpu.memory_space<vmem>>, %arg9: memref<1x128xf32, #tpu.memory_space<vmem>>, %arg10: memref<8x128xf32, #tpu.memory_space<vmem>>) attributes {dimension_semantics = [#tpu.dimension_semantics<parallel>], iteration_bounds = array<i64: 3>, scalar_prefetch = 0 : i64, scratch_operands = 0 : i64, tpu.core_type = #tpu.core_type<tc>, window_params = [{transform_indices = @transform_0, window_bounds = array<i64: 8, 16>}, {transform_indices = @transform_1, window_bounds = array<i64: 8, 8>}, {pipeline_mode = #tpu.pipeline_mode<synchronous>, transform_indices = @transform_2, window_bounds = array<i64: 16, 32>}, {pipeline_mode = #tpu.pipeline_mode<synchronous>, transform_indices = @transform_3, window_bounds = array<i64: 8, 32>}, {pipeline_mode = #tpu.pipeline_mode<synchronous>, transform_indices = @transform_4, window_bounds = array<i64: 1, 32>}, {pipeline_mode = #tpu.pipeline_mode<synchronous>, transform_indices = @transform_5, window_bounds = array<i64: 32, 32>}, {pipeline_mode = #tpu.pipeline_mode<synchronous>, transform_indices = @transform_6, window_bounds = array<i64: 1, 32>}, {pipeline_mode = #tpu.pipeline_mode<synchronous>, transform_indices = @transform_7, window_bounds = array<i64: 32, 128>}, {pipeline_mode = #tpu.pipeline_mode<synchronous>, transform_indices = @transform_8, window_bounds = array<i64: 1, 128>}, {transform_indices = @transform_9, window_bounds = array<i64: 8, 128>}]} {
    %c0 = arith.constant 0 : index
    %c0_0 = arith.constant 0 : index
    %0 = vector.load %arg1[%c0, %c0_0] : memref<8x16xf32, #tpu.memory_space<vmem>>, vector<8x16xf32>
    %c0_1 = arith.constant 0 : index
    %c0_2 = arith.constant 0 : index
    %1 = vector.load %arg3[%c0_1, %c0_2] : memref<16x32xf32, #tpu.memory_space<vmem>>, vector<16x32xf32>
    %cst = arith.constant dense<0.000000e+00> : vector<8x32xf32>
    %2 = tpu.matmul %0, %1, %cst {dimension_numbers = #tpu.dot_dimension_numbers<[1], [0], [0], [1], [0, 0, 1, 1], [], []>} : vector<8x16xf32>, vector<16x32xf32>, vector<8x32xf32> -> vector<8x32xf32>
    %c0_3 = arith.constant 0 : index
    %c0_4 = arith.constant 0 : index
    %3 = vector.load %arg2[%c0_3, %c0_4] : memref<8x8xf32, #tpu.memory_space<vmem>>, vector<8x8xf32>
    %c0_5 = arith.constant 0 : index
    %c0_6 = arith.constant 0 : index
    %4 = vector.load %arg4[%c0_5, %c0_6] : memref<8x32xf32, #tpu.memory_space<vmem>>, vector<8x32xf32>
    %cst_7 = arith.constant dense<0.000000e+00> : vector<8x32xf32>
    %5 = tpu.matmul %3, %4, %cst_7 {dimension_numbers = #tpu.dot_dimension_numbers<[1], [0], [0], [1], [0, 0, 1, 1], [], []>} : vector<8x8xf32>, vector<8x32xf32>, vector<8x32xf32> -> vector<8x32xf32>
    %6 = arith.addf %2, %5 : vector<8x32xf32>
    %c0_8 = arith.constant 0 : index
    %c0_9 = arith.constant 0 : index
    %7 = vector.load %arg5[%c0_8, %c0_9] : memref<1x32xf32, #tpu.memory_space<vmem>>, vector<1x32xf32>
    %8 = vector.broadcast %7 : vector<1x32xf32> to vector<8x32xf32>
    %9 = arith.addf %6, %8 : vector<8x32xf32>
    %cst_10 = arith.constant 0.000000e+00 : f32
    %10 = vector.broadcast %cst_10 : f32 to vector<8x32xf32>
    %11 = arith.maximumf %9, %10 : vector<8x32xf32>
    %c0_11 = arith.constant 0 : index
    %c0_12 = arith.constant 0 : index
    %12 = vector.load %arg6[%c0_11, %c0_12] : memref<32x32xf32, #tpu.memory_space<vmem>>, vector<32x32xf32>
    %cst_13 = arith.constant dense<0.000000e+00> : vector<8x32xf32>
    %13 = tpu.matmul %11, %12, %cst_13 {dimension_numbers = #tpu.dot_dimension_numbers<[1], [0], [0], [1], [0, 0, 1, 1], [], []>} : vector<8x32xf32>, vector<32x32xf32>, vector<8x32xf32> -> vector<8x32xf32>
    %c0_14 = arith.constant 0 : index
    %c0_15 = arith.constant 0 : index
    %14 = vector.load %arg7[%c0_14, %c0_15] : memref<1x32xf32, #tpu.memory_space<vmem>>, vector<1x32xf32>
    %15 = vector.broadcast %14 : vector<1x32xf32> to vector<8x32xf32>
    %16 = arith.addf %13, %15 : vector<8x32xf32>
    %cst_16 = arith.constant 0.000000e+00 : f32
    %17 = vector.broadcast %cst_16 : f32 to vector<8x32xf32>
    %18 = arith.maximumf %16, %17 : vector<8x32xf32>
    %c0_17 = arith.constant 0 : index
    %c0_18 = arith.constant 0 : index
    %19 = vector.load %arg8[%c0_17, %c0_18] : memref<32x128xf32, #tpu.memory_space<vmem>>, vector<32x128xf32>
    %cst_19 = arith.constant dense<0.000000e+00> : vector<8x128xf32>
    %20 = tpu.matmul %18, %19, %cst_19 {dimension_numbers = #tpu.dot_dimension_numbers<[1], [0], [0], [1], [0, 0, 1, 1], [], []>} : vector<8x32xf32>, vector<32x128xf32>, vector<8x128xf32> -> vector<8x128xf32>
    %c0_20 = arith.constant 0 : index
    %c0_21 = arith.constant 0 : index
    %21 = vector.load %arg9[%c0_20, %c0_21] : memref<1x128xf32, #tpu.memory_space<vmem>>, vector<1x128xf32>
    %22 = vector.broadcast %21 : vector<1x128xf32> to vector<8x128xf32>
    %23 = arith.addf %20, %22 : vector<8x128xf32>
    %24 = math.tanh %23 : vector<8x128xf32>
    %cst_22 = arith.constant 2.000000e+00 : f32
    %25 = vector.broadcast %cst_22 : f32 to vector<8x128xf32>
    %26 = arith.mulf %25, %24 : vector<8x128xf32>
    %c0_23 = arith.constant 0 : index
    %c0_24 = arith.constant 0 : index
    %27 = vector.load %arg10[%c0_23, %c0_24] : memref<8x128xf32, #tpu.memory_space<vmem>>, vector<8x128xf32>
    tpu.vector_store %arg10[%c0_23, %c0_24], %26 {strides = array<i32>} : memref<8x128xf32, #tpu.memory_space<vmem>>, vector<8x128xf32>,
    return
  }
  func.func @transform_0(%arg0: i32) -> (i32, i32) {
    %c0_i32 = arith.constant 0 : i32
    %c0_i32_0 = arith.constant 0 : i32
    return %arg0, %c0_i32 : i32, i32
  }
  func.func @transform_1(%arg0: i32) -> (i32, i32) {
    %c0_i32 = arith.constant 0 : i32
    %c0_i32_0 = arith.constant 0 : i32
    return %arg0, %c0_i32 : i32, i32
  }
  func.func @transform_2(%arg0: i32) -> (i32, i32) {
    %c0_i32 = arith.constant 0 : i32
    %c0_i32_0 = arith.constant 0 : i32
    %c0_i32_1 = arith.constant 0 : i32
    return %c0_i32, %c0_i32_0 : i32, i32
  }
  func.func @transform_3(%arg0: i32) -> (i32, i32) {
    %c0_i32 = arith.constant 0 : i32
    %c0_i32_0 = arith.constant 0 : i32
    %c0_i32_1 = arith.constant 0 : i32
    return %c0_i32, %c0_i32_0 : i32, i32
  }
  func.func @transform_4(%arg0: i32) -> (i32, i32) {
    %c0_i32 = arith.constant 0 : i32
    %c0_i32_0 = arith.constant 0 : i32
    %c0_i32_1 = arith.constant 0 : i32
    return %c0_i32, %c0_i32_0 : i32, i32
  }
  func.func @transform_5(%arg0: i32) -> (i32, i32) {
    %c0_i32 = arith.constant 0 : i32
    %c0_i32_0 = arith.constant 0 : i32
    %c0_i32_1 = arith.constant 0 : i32
    return %c0_i32, %c0_i32_0 : i32, i32
  }
  func.func @transform_6(%arg0: i32) -> (i32, i32) {
    %c0_i32 = arith.constant 0 : i32
    %c0_i32_0 = arith.constant 0 : i32
    %c0_i32_1 = arith.constant 0 : i32
    return %c0_i32, %c0_i32_0 : i32, i32
  }
  func.func @transform_7(%arg0: i32) -> (i32, i32) {
    %c0_i32 = arith.constant 0 : i32
    %c0_i32_0 = arith.constant 0 : i32
    %c0_i32_1 = arith.constant 0 : i32
    return %c0_i32, %c0_i32_0 : i32, i32
  }
  func.func @transform_8(%arg0: i32) -> (i32, i32) {
    %c0_i32 = arith.constant 0 : i32
    %c0_i32_0 = arith.constant 0 : i32
    %c0_i32_1 = arith.constant 0 : i32
    return %c0_i32, %c0_i32_0 : i32, i32
  }
  func.func @transform_9(%arg0: i32) -> (i32, i32) {
    %c0_i32 = arith.constant 0 : i32
    %c0_i32_0 = arith.constant 0 : i32
    return %arg0, %c0_i32 : i32, i32
  }
}

</mosaic_0001>

<bundles_post_ra>
// kernel: tpu_custom_call.1
= control target key start
LH: loop header
LB: loop body
LE: loop exit
PB: predicated region body
PF: predicated region fallthrough
CT: control target
= control target key end

     0   :  { %s1030_s0 = inlined_call_operand.vmem [shape: f32[24,16], index: 0, kind: input, shape index: {}]   ;;  %s1031_s1 = inlined_call_operand.vmem [shape: f32[24,8], index: 1, kind: input, shape index: {}]   ;;  %s1032_s2 = inlined_call_operand.hbm [shape: f32[16,32], index: 2, kind: input, shape index: {}]   ;;  %s1033_s3 = inlined_call_operand.hbm [shape: f32[8,32], index: 3, kind: input, shape index: {}]   ;;  %s1034_s4 = inlined_call_operand.vmem [shape: f32[1,32], index: 4, kind: input, shape index: {}]   ;;  %s1035_s5 = inlined_call_operand.vmem [shape: f32[32,32], index: 5, kind: input, shape index: {}]   ;;  %s1036_s6 = inlined_call_operand.vmem [shape: f32[1,32], index: 6, kind: input, shape index: {}]   ;;  %s1037_s7 = inlined_call_operand.vmem [shape: f32[32,128], index: 7, kind: input, shape index: {}]   ;;  %s1038_s8 = inlined_call_operand.vmem [shape: f32[1,128], index: 8, kind: input, shape index: {}]   ;;  %s1039_s9 = inlined_call_operand.hbm [shape: f32[24,128], index: 9, kind: output, shape index: {}]  }
   0x1   :  { %1040 = sst [smem:[#allocation11_spill]] %s1030_s0 }
   0x2   :  { %14 = vsyncpa [#allocation3], 0 }
   0x3   :  { %15 = vsyncpa [#allocation6], 0 }
   0x4   :  { %16 = vsyncpa [#allocation4], 0 }
   0x5   :  { %18 = vsyncpa [#allocation4 + $0x1], 0  ;;  %s884_s30 = smov 0   ;;  %s886_s10 = smov 0  }
   0x6   :  { %s888_s11 = smov 0   ;;  %s890_s12 = smov 0  }
   0x7 LB: > { %s905_s13 = sadd.s32 4294967295, %s828_s12   ;;  %s612_s14 = sadd.s32 4294967294, %s828_s12   ;;  %s828_s12 = sphi %s890_s12, %s1048_s12   ;;  %s824_s11 = sphi %s888_s11, %s1047_s11   ;;  %s820_s10 = sphi %s886_s10, %s1046_s10   ;;  %s816_s30 = sphi %s884_s30, %s1045_s30  }
   0x8   : > { %s909_s15 = sadd.s32 1, %s828_s12   ;;  %s230_s16 = sadd.s32 1, %s824_s11 }
   0x9   : > { %s227_s17 = ssub.s32 %s828_s12, %s909_s15  ;;  %p240_p0 = scmp.ne.s32.totalorder %s824_s11, %s820_s10 }
   0xa   : > { %p228_p1 = scmp.eq.s32.totalorder %s227_s17, 0  ;;  %p241_p2 = scmp.eq.s32.totalorder %s905_s13, 2 }
   0xb   : > { %p246_p3 = scmp.ne.s32.totalorder %s820_s10, %s816_s30  ;;  %p247_p4 = scmp.eq.s32.totalorder %s612_s14, 2 }
   0xc   : > { %s920_s18 = scalar_select %p228_p1, %s824_s11, %s230_s16  }
   0xd   : > { %p922_p5 = por %p241_p2, %p240_p0  ;;  %p926_p6 = por %p247_p4, %p246_p3 }
   0xe   : > { %p613_p7 = scmp.ge.s32.totalorder %s828_s12, 1  ;;  %p254_p8 = scmp.lt.s32.totalorder %s828_s12, 4 }
   0xf   : > { %p652_p9 = scmp.eq.s32.totalorder %s905_s13, 0  ;;  %s265_s24 = sshll.u32 %s1032_s2, 4  ;;  %s266_s24 = int_to_ptr.hbm [resolvable:$true] %s265_s24 }
  0x10   : > { %p933_p10 = pnand %p613_p7, %p254_p8  ;;  %s830_s25 = smov [#allocation2]  }
  0x11   : > { %s267_s26 = sshll.u32 %s830_s25, 4  ;;  %s280_s29 = sshll.u32 %s1033_s3, 4  ;;  %s268_s26 = int_to_ptr.vmem [resolvable:$true] %s267_s26  ;;  %s281_s29 = int_to_ptr.hbm [resolvable:$true] %s280_s29 }
  0x12   : > { %p641_p11 = pneg %p933_p10  ;;  %s831_s14 = smov 128  }
  0x13   : > { %s832_s16 = smov 8   ;;  %s833_s17 = smov [#allocation5]  }
  0x14   : > { %p642_p12 = pnand %p652_p9, %p641_p11  ;;  %s282_s22 = sshll.u32 %s833_s17, 4  ;;  %s283_s22 = int_to_ptr.vmem [resolvable:$true] %s282_s22 }
  0x15   : > { %324 = sbr.rel (%p933_p10) target bundleno = 451 (0x1c3), region = 56 }
  0x16   : > { %644 = dma.hbm_to_vmem [thread:$0]  (!%p642_p12), %s266_s24, 256, %s268_s26, [#allocation3], %s831_s14, %s831_s14, %s832_s16  }
  0x17   : > { %647 = dma.hbm_to_vmem [thread:$0]  (!%p642_p12), %s281_s29, 128, %s283_s22, [#allocation6]  }
  0x1a   : > { %803 = dma.done.wait (%p652_p9), [#allocation3], 256  }
  0x1b   : > { %805 = vsyncadd (%p652_p9), [#allocation3], 4294967040 }
  0x1c   : > { %807 = dma.done.wait (%p652_p9), [#allocation6], 128  }
  0x1d   : > { %809 = vsyncadd (%p652_p9), [#allocation6], 4294967168  ;;  %p369_p13 = scmp.lt.s32.totalorder %s905_s13, 2  ;;  %s1044_s0 = sld [smem:[#allocation11_spill]]  ;;  %vm382_vm0 = vcmask 64512   ;;  %v379_v0 = vld [vmem:[#allocation2 + $0x8] sm:$0xff] }
  0x1e   : > { %v381_v1 = vld [vmem:[#allocation5] sm:$0xff]  ;;  %v378_v2 = vld [vmem:[#allocation2] sm:$0xff]  ;;  %424 = vmatpush.msra.mxu1 %v379_v0  ;;  %vm406_vm1 = vcmask 130048   ;;  %v439_v5 = vld [vmem:[%s1035_s5 + $0x18] sm:$0xff]  ;;  %vm444_vm2 = vcmask 261120   ;;  %s366_s28 = sand.u32 1, %s820_s10  }
  0x1f   : > { %s370_s23 = scalar_select %p369_p13, %s905_s13, 2  ;;  %401 = vmatpush.msra.mxu0 %v381_v1  ;;  %460 = vmatpush.msra.mxu2 %v439_v5  ;;  %v438_v6 = vld [vmem:[%s1035_s5 + $0x10] sm:$0xff]  ;;  %v437_v7 = vld [vmem:[%s1035_s5 + $0x8] sm:$0xff]  ;;  %v436_v8 = vld [vmem:[%s1035_s5] sm:$0xff] }
  0x20   : > { %425 = vmatpush.msra.mxu1 %v378_v2  ;;  %v472_v9 = vld [vmem:[%s1037_s7 + $0x18] sm:$0xff]  ;;  %v693_v11 = vld [vmem:[%s1034_s4] ss:$0 sm:$0xff]  ;;  %v471_v16 = vld [vmem:[%s1037_s7 + $0x10] sm:$0xff]  ;;  %s628_s14 = sshll.u32 %s905_s13, 3  ;;  %s504_s21 = scalar_lea.sflag [#allocation4], %s366_s28 }
  0x21   : > { %s621_s24 = sshll.u32 %s370_s23, 3  ;;  %461 = vmatpush.msra.mxu2 %v438_v6  ;;  %492 = vmatpush.msra.mxu3 %v472_v9  ;;  %v470_v17 = vld [vmem:[%s1037_s7 + $0x8] sm:$0xff]  ;;  %v469_v18 = vld [vmem:[%s1037_s7] sm:$0xff]  ;;  %s514_s22 = scalar_lea.hbm %s1039_s9, %s628_s14 }
  0x22   : > { %s376_s26 = scalar_lea.vmem %s1031_s1, %s621_s24  ;;  %v694_v19 = vld [vmem:[%s1036_s6] ss:$0 sm:$0xff]  ;;  %s518_s25 = sshll.u32 %s514_s22, 4  ;;  %s519_s25 = int_to_ptr.hbm [resolvable:$true] %s518_s25 }
  0x23   : > { %s372_s29 = scalar_lea.vmem %s1044_s0, %s621_s24  ;;  %v380_v3 = vld [vmem:[%s376_s26] sm:$0xff]  ;;  %462 = vmatpush.msra.mxu2 %v437_v7  ;;  %493 = vmatpush.msra.mxu3 %v471_v16  ;;  %s772_s26 = sshra.s32 %s519_s25, 4  ;;  %s773_s26 = int_to_ptr.hbm [resolvable:$true] %s772_s26 }
  0x24   : > { %v377_v4 = vld [vmem:[%s372_s29] sm:$0xff]  ;;  %623 = vmatmul.msk.f32.vlgmr.msra.gmra.mxu0 %vm382_vm0, %v380_v3  ;;  %s620_s29 = sshll.u32 %s366_s28, 3  ;;  %s774_s27 = scalar_lea.hbm %s773_s26, 8 }
  0x25   : > { %624 = vmatmul.msk.f32.vlgmr.msra.gmra.mxu1 %vm406_vm1, %v377_v4  ;;  %463 = vmatpush.msra.mxu2 %v436_v8  ;;  %v695_v23 = vld [vmem:[%s1038_s8] ss:$0 sm:$0xff]  ;;  %s368_s23 = scalar_lea.vmem [#allocation7], %s620_s29  ;;  %p775_p0 = scmp.ne.s32.totalorder %s773_s26, %s774_s27 }
  0x26   : > { %494 = vmatpush.msra.mxu3 %v470_v17  ;;  %s516_s24 = sshll.u32 %s368_s23, 4  ;;  %s778_s14 = scalar_lea.hbm %s1039_s9, 24  ;;  %s517_s24 = int_to_ptr.vmem [resolvable:$true] %s516_s24 }
  0x27   : > { %p776_p1 = pnand %p775_p0, %p922_p5  ;;  %p779_p3 = scmp.lt.s32.totalorder %s773_s26, %s1039_s9 }
  0x28   : > { %495 = vmatpush.msra.mxu3 %v469_v18  ;;  %p780_p4 = scmp.lt.s32.totalorder %s778_s14, %s774_s27 }
  0x29   : > { %p777_p2 = pneg %p776_p1 }
  0x2a   : > { %p781_p7 = por %p780_p4, %p779_p3 }
  0x2c   : > { %p782_p8 = pnand %p781_p7, %p777_p2 }
  0xa1   : > { %v403_v10 = vpop.f32.mrf.mxu0 }
  0xa2   : > { %v427_v12 = vpop.f32.mrf.mxu1 }
  0xa3   : > { %v428_v13 = vadd.f32 %v427_v12, %v403_v10 }
  0xa5   : > { %v434_v14 = vadd.f32 %v693_v11, %v428_v13 }
  0xa7   : > { %v435_v15 = vmax.f32 %v434_v14, 0.0 }
  0xa9   : > { %625 = vmatmul.msk.f32.vlgmr.msra.gmra.mxu2 %vm444_vm2, %v435_v15 }
 0x12c   : > { %v465_v20 = vpop.f32.mrf.mxu2 }
 0x12d   : > { %v466_v21 = vadd.f32 %v694_v19, %v465_v20 }
 0x12f   : > { %v468_v22 = vmax.f32 %v466_v21, 0.0 }
 0x131   : > { %626 = vmatmul.msk.f32.vlgmr.msra.gmra.mxu3 %vm444_vm2, %v468_v22 }
 0x1b4   : > { %v497_v24 = vpop.f32.mrf.mxu3 }
 0x1b5   : > { %v498_v25 = vadd.f32 %v695_v23, %v497_v24 }
 0x1b7   : > { %696 = vtanh.f32 %v498_v25 }
 0x1bd   : > { %v697_v26 = vpop.eup %696 }
 0x1be   : > { %v501_v27 = vmul.f32 2.0, %v697_v26 }
 0x1c0   : > { %502 = vst [vmem:[%s368_s23] sm:$0xff] %v501_v27 }
 0x1c1   : > { %785 = shalt.err (!%p782_p8)
}
 0x1c2   : > { %639 = dma.vmem_to_hbm [thread:$0]  (%p922_p5), %s517_s24, 128, %s519_s25, %s504_s21  }
 0x1c3 PF: > { %p656_p9 = scmp.ge.s32.totalorder %s828_s12, 2  ;;  %s530_s28 = sand.u32 1, %s816_s30  }
 0x1c4   : > { %s531_s0 = scalar_lea.sflag [#allocation4], %s530_s28 }
 0x1c5   : > { %p649_p10 = pnand %p656_p9, %p926_p6 }
 0x1c7   : > { %p650_p11 = pneg %p649_p10 }
 0x1c9   : > { %811 = dma.done.wait (%p650_p11), %s531_s0, 128  }
 0x1ca   : > { %813 = vsyncadd (%p650_p11), %s531_s0, 4294967168  ;;  %p21_p12 = scmp.ge.s32.totalorder %s909_s15, 5   ;;  %s1045_s30 = smov %s820_s10 }
 0x1cb   : > { %s1046_s10 = smov %s824_s11  ;;  %s1047_s11 = smov %s920_s18 }
 0x1cc   : > { %s1048_s12 = smov %s909_s15  ;;  %23 = sbr.rel (!%p21_p12) target bundleno = 7 (0x7), region = 103 }
 0x1d1   :  { %537 = vsyncpa [#allocation3], 1 }
 0x1d2   :  { %539 = vsyncpa [#allocation3 + $0x1], 1 }
 0x1d3   :  { %540 = vsyncpa [#allocation6], 1 }
 0x1d4   :  { %541 = vsyncpa [#allocation4], 1 }
 0x1d5   :  { %543 = vsyncpa [#allocation4 + $0x1], 1 }

</bundles_post_ra>
